<compile_context>
chip_gen: v6e
topology: v6e:2x2x1
jax: 0.10.0
libtpu: 0.0.40
codegen_flags: <defaults>
</compile_context>

<pallas_src>
import jax
import jax.numpy as jnp
from jax import lax
from jax.experimental import pallas as pl
from jax.experimental.pallas import tpu as pltpu


def _lwa_kernel(x_ref, w1_ref, w2_ref, out_ref, attn_ref, h_ref):
    # x_ref:    (Bb, S, D)   native dtype
    # w1_ref:   (D, D)       torch l1_linear.weight
    # w2_ref:   (tl, D)      torch l2_linear.weight tile (tl labels)
    # out_ref:  (Bb, tl, D)  native dtype
    # attn_ref: (Bb, tl, S)  float32 (torch (B, L, S) layout, lane-dense for S >= 128)
    # h_ref:    (Bb*S, D)    VMEM scratch, native dtype, reused across L tiles
    Bb, S, D = x_ref.shape
    tl = w2_ref.shape[0]
    l = pl.program_id(1)

    x = x_ref[...]                                   # (Bb, S, D), native dtype

    # h = tanh(x @ W1.T): compute once per batch block (first L tile) and reuse.
    # Batch is folded into the MXU M dimension; S is a multiple of the sublane count
    # in practice so the reshape is a free re-view.
    @pl.when(l == 0)
    def _():
        x2 = x.reshape(Bb * S, D)
        h = jnp.tanh(
            lax.dot_general(x2, w1_ref[...], (((1,), (1,)), ((), ())),
                            preferred_element_type=jnp.float32))
        h_ref[...] = h.astype(h_ref.dtype)           # back to native dtype for the MXU

    # logits = h @ W2_tile.T  (contract the weight in-feature dim; no transpose formed)
    logits = lax.dot_general(h_ref[...], w2_ref[...], (((1,), (1,)), ((), ())),
                             preferred_element_type=jnp.float32)    # (Bb*S, tl)
    logits = logits.reshape(Bb, S, tl)

    # Softmax over the sequence axis (torch Softmax(dim=1)), in f32, exact reciprocal.
    m = jnp.max(logits, axis=1, keepdims=True)                      # (Bb, 1, tl)
    e = jnp.exp(logits - m)                                         # (Bb, S, tl)
    denom = jnp.sum(e, axis=1, keepdims=True)                       # (Bb, 1, tl)
    probs = e * pl.reciprocal(denom)                                # exact; (Bb, S, tl)

    # out[b] = probs[b].T @ x[b]: contract S directly (batched dot_general), feeding the
    # MXU native-dtype operands with f32 accumulation.
    out = lax.dot_general(probs.astype(x.dtype), x,
                          (((1,), (1,)), ((0,), (0,))),
                          preferred_element_type=jnp.float32)       # (Bb, tl, D)
    out_ref[...] = out.astype(out_ref.dtype)

    # Store attention weights in torch's (L, S) per-batch layout: one 2-D transpose per
    # batch element on the XLU (which has slack; MXU/VPU are the binding units).
    for b in range(Bb):                                             # static unroll
        attn_ref[b, :, :] = probs[b].T.astype(attn_ref.dtype)


def _vmem_capacity_bytes():
    """Per-TensorCore VMEM capacity; conservative 64 MiB (v7x) fallback."""
    try:
        info = pltpu.get_tpu_info()
        cap = getattr(info, "vmem_capacity_bytes", None)
        if cap:
            return int(cap)
    except Exception:
        pass
    return 64 << 20


def _pick_label_block(L, max_tl=8192):
    """Single L tile for modest label sets; for very large L pick a divisor that is a
    multiple of 8 (BlockSpec sublane constraint), preferring multiples of 128."""
    if L <= max_tl:
        return L
    divs = [t for t in range(8, max_tl + 1, 8) if L % t == 0]
    pref = [t for t in divs if t % 128 == 0] or divs
    return max(pref) if pref else L


def _pick_batch_block(B, S, D, tl, x_dtype, vmem_budget):
    """Largest divisor of B whose per-step working set fits the VMEM budget, preferring
    a grid of >= 2 (and even) batch steps for v7x megacore sharding and Bb*S % 8 == 0."""
    itemsize = jnp.dtype(x_dtype).itemsize

    def step_bytes(bb):
        x_blk = 2 * bb * S * D * itemsize              # double-buffered input
        out_blk = 2 * bb * tl * D * itemsize
        attn_blk = 2 * bb * tl * S * 4                  # attn emitted in f32
        weights = 2 * (D * D + tl * D) * itemsize       # conservative (double-buffered)
        h_scr = bb * S * D * itemsize
        temps = 4 * (bb * S * D + 3 * bb * S * tl + bb * tl * D)   # f32 intermediates
        return x_blk + out_blk + attn_blk + weights + h_scr + temps

    divisors = [bb for bb in range(1, B + 1) if B % bb == 0]
    fitting = [bb for bb in divisors if step_bytes(bb) <= vmem_budget] or [1]
    # NOTE: if B is prime and large this degenerates to bb=1 (correct but overhead-y);
    # pad the batch upstream if that matters.

    def score(bb):
        n = B // bb
        return (
            n >= 2,                  # keep >= 2 batch steps (megacore / DMA overlap)
            n % 2 == 0 or n == 1,    # even split across the two v7x TensorCores
            (bb * S) % 8 == 0,       # sublane-aligned folded-M reshape
            bb,                      # then the largest block that fits
        )

    return max(fitting, key=score)


def label_wise_attention(x, w1, w2, *, batch_block=None, label_block=None,
                         single_buffer_weights=True, vmem_budget_bytes=None):
    """x: (B, S, D), w1: (D, D), w2: (L, D) -> (out (B, L, D), attn (B, L, S) f32)."""
    B, S, D = x.shape
    L, D2 = w2.shape
    assert D2 == D and w1.shape == (D, D)

    cap = _vmem_capacity_bytes()
    if vmem_budget_bytes is None:
        vmem_budget_bytes = int(cap * 0.7)
    vmem_limit = int(cap * 0.75)

    if label_block is None:
        label_block = _pick_label_block(L)
    assert L % label_block == 0
    assert label_block == L or label_block % 8 == 0
    n_ltiles = L // label_block

    if batch_block is None:
        batch_block = _pick_batch_block(B, S, D, label_block, x.dtype, vmem_budget_bytes)
    assert B % batch_block == 0, "batch_block must divide B"
    n_blocks = B // batch_block

    attn_dtype = jnp.float32   # parity with torch softmax output even for bf16 x
    out_shapes = (
        jax.ShapeDtypeStruct((B, L, D), x.dtype),
        jax.ShapeDtypeStruct((B, L, S), attn_dtype),
    )

    itemsize = jnp.dtype(x.dtype).itemsize
    cost = pl.CostEstimate(
        flops=2 * B * S * D * D + 2 * B * S * D * L + 2 * B * L * S * D,
        transcendentals=B * S * D + B * S * L,
        bytes_accessed=(x.size + w1.size + w2.size + B * L * D) * itemsize + B * L * S * 4,
    )

    def _build(single_buffer):
        def weight_spec(shape, index_map, constant_index):
            if single_buffer and constant_index:
                # Constant index map -> never re-fetched; single-buffer to save VMEM.
                return pl.BlockSpec(shape, index_map, pipeline_mode=pl.Buffered(1))
            return pl.BlockSpec(shape, index_map)

        grid_spec = pltpu.PrefetchScalarGridSpec(
            num_scalar_prefetch=0,
            grid=(n_blocks, n_ltiles),
            in_specs=[
                pl.BlockSpec((batch_block, S, D), lambda b, l: (b, 0, 0)),
                weight_spec((D, D), lambda b, l: (0, 0), constant_index=True),
                weight_spec((label_block, D), lambda b, l: (l, 0),
                            constant_index=(n_ltiles == 1)),
            ],
            out_specs=[
                pl.BlockSpec((batch_block, label_block, D), lambda b, l: (b, l, 0)),
                pl.BlockSpec((batch_block, label_block, S), lambda b, l: (b, l, 0)),
            ],
            scratch_shapes=[pltpu.VMEM((batch_block * S, D), x.dtype)],
        )
        return pl.pallas_call(
            _lwa_kernel,
            out_shape=out_shapes,
            grid_spec=grid_spec,
            compiler_params=pltpu.CompilerParams(
                dimension_semantics=("parallel", "arbitrary"),
                vmem_limit_bytes=vmem_limit,
            ),
            cost_estimate=cost,
        )

    try:
        out, attn = _build(single_buffer_weights)(x, w1, w2)
    except Exception:
        if not single_buffer_weights:
            raise
        # Fallback if this JAX build rejects pipeline_mode / Buffered(1) on TPU.
        out, attn = _build(False)(x, w1, w2)
    return out, attn


def _reference(x, w1, w2):
    h = jnp.tanh(jnp.einsum("bsd,ed->bse", x, w1))
    logits = jnp.einsum("bse,le->bsl", h, w2)
    probs = jax.nn.softmax(logits, axis=1)          # over sequence axis
    attn_w = jnp.transpose(probs, (0, 2, 1))        # (B, L, S)
    out = jnp.einsum("bls,bsd->bld", attn_w, x)
    return out, attn_w


if __name__ == "__main__":
    # Small shapes consistent with the module: batch=4, seq(chunk tokens)=8, d_model=32,
    # num_labels=16.
    B, S, D, L = 4, 8, 32, 16
    key = jax.random.PRNGKey(0)
    kx, k1, k2 = jax.random.split(key, 3)

    x = jax.random.normal(kx, (B, S, D), dtype=jnp.float32)
    # Deterministic init matching torch.nn.init.normal_(mean=0.0, std=0.03)
    linear_init_mean, linear_init_std = 0.0, 0.03
    w1 = linear_init_mean + linear_init_std * jax.random.normal(k1, (D, D), dtype=jnp.float32)
    w2 = linear_init_mean + linear_init_std * jax.random.normal(k2, (L, D), dtype=jnp.float32)

    out, attn = label_wise_attention(x, w1, w2)
    out = jax.block_until_ready(out)
    attn = jax.block_until_ready(attn)

    ref_out, ref_attn = _reference(x, w1, w2)
    assert out.shape == (B, L, D) and attn.shape == (B, L, S)
    # out tolerance covers TPU default f32 matmul precision-path differences between the
    # Mosaic kernel and the XLA reference; attn is much tighter now that the softmax
    # reciprocal is exact.
    assert jnp.allclose(out, ref_out, atol=5e-3, rtol=5e-3)
    assert jnp.allclose(attn, ref_attn, atol=1e-3, rtol=1e-3)
    # Exact reciprocal: attention rows sum to 1.
    assert jnp.allclose(jnp.sum(attn, axis=-1), 1.0, atol=1e-5)

    # TODO(synk): the rest of CodingModel (pretrained AutoModel transformer, GCN layers fed
    # by external drug.pkl / newwikivec.npy, dropout, BCEWithLogitsLoss) is outside the
    # scope of this kernel.
    print("KERNEL_OK")
</pallas_src>

<mosaic_0001>
module attributes {stable_mosaic.version = 11 : i64} {
  func.func @_lwa_kernel(%arg0: i32, %arg1: i32, %arg2: memref<2x8x32xf32, #tpu.memory_space<vmem>>, %arg3: memref<32x32xf32, #tpu.memory_space<vmem>>, %arg4: memref<16x32xf32, #tpu.memory_space<vmem>>, %arg5: memref<2x16x32xf32, #tpu.memory_space<vmem>>, %arg6: memref<2x16x8xf32, #tpu.memory_space<vmem>>, %arg7: memref<16x32xf32, #tpu.memory_space<vmem>>) attributes {dimension_semantics = [#tpu.dimension_semantics<parallel>, #tpu.dimension_semantics<arbitrary>], iteration_bounds = array<i64: 2, 1>, scalar_prefetch = 0 : i64, scratch_operands = 1 : i64, tpu.core_type = #tpu.core_type<tc>, window_params = [{transform_indices = @transform_0, window_bounds = array<i64: 2, 8, 32>}, {pipeline_mode = #tpu.pipeline_mode<synchronous>, transform_indices = @transform_1, window_bounds = array<i64: 32, 32>}, {pipeline_mode = #tpu.pipeline_mode<synchronous>, transform_indices = @transform_2, window_bounds = array<i64: 16, 32>}, {transform_indices = @transform_3, window_bounds = array<i64: 2, 16, 32>}, {transform_indices = @transform_4, window_bounds = array<i64: 2, 16, 8>}]} {
    %c0 = arith.constant 0 : index
    %c0_0 = arith.constant 0 : index
    %c0_1 = arith.constant 0 : index
    %0 = vector.load %arg2[%c0, %c0_0, %c0_1] : memref<2x8x32xf32, #tpu.memory_space<vmem>>, vector<2x8x32xf32>
    %c0_i32 = arith.constant 0 : i32
    %1 = arith.cmpi eq, %arg1, %c0_i32 : i32
    %2 = arith.extui %1 : i1 to i32
    %c0_i32_2 = arith.constant 0 : i32
    %3 = arith.cmpi ne, %2, %c0_i32_2 : i32
    scf.if %3 {
      %32 = vector.shape_cast %0 : vector<2x8x32xf32> to vector<16x32xf32>
      %c0_18 = arith.constant 0 : index
      %c0_19 = arith.constant 0 : index
      %33 = vector.load %arg3[%c0_18, %c0_19] : memref<32x32xf32, #tpu.memory_space<vmem>>, vector<32x32xf32>
      %cst_20 = arith.constant dense<0.000000e+00> : vector<16x32xf32>
      %34 = tpu.matmul %32, %33, %cst_20 {dimension_numbers = #tpu.dot_dimension_numbers<[1], [1], [0], [0], [0, 0, 1, 0], [], []>} : vector<16x32xf32>, vector<32x32xf32>, vector<16x32xf32> -> vector<16x32xf32>
      %35 = math.tanh %34 : vector<16x32xf32>
      %c0_21 = arith.constant 0 : index
      %c0_22 = arith.constant 0 : index
      %36 = vector.load %arg7[%c0_21, %c0_22] : memref<16x32xf32, #tpu.memory_space<vmem>>, vector<16x32xf32>
      tpu.vector_store %arg7[%c0_21, %c0_22], %35 {strides = array<i32>} : memref<16x32xf32, #tpu.memory_space<vmem>>, vector<16x32xf32>,
    } else {
    }
    %c0_3 = arith.constant 0 : index
    %c0_4 = arith.constant 0 : index
    %4 = vector.load %arg7[%c0_3, %c0_4] : memref<16x32xf32, #tpu.memory_space<vmem>>, vector<16x32xf32>
    %c0_5 = arith.constant 0 : index
    %c0_6 = arith.constant 0 : index
    %5 = vector.load %arg4[%c0_5, %c0_6] : memref<16x32xf32, #tpu.memory_space<vmem>>, vector<16x32xf32>
    %cst = arith.constant dense<0.000000e+00> : vector<16x16xf32>
    %6 = tpu.matmul %4, %5, %cst {dimension_numbers = #tpu.dot_dimension_numbers<[1], [1], [0], [0], [0, 0, 1, 0], [], []>} : vector<16x32xf32>, vector<16x32xf32>, vector<16x16xf32> -> vector<16x16xf32>
    %7 = vector.shape_cast %6 : vector<16x16xf32> to vector<2x8x16xf32>
    %cst_7 = arith.constant dense<0xFF800000> : vector<2x16xf32>
    %8 = vector.multi_reduction <maximumf>, %7, %cst_7 [1] : vector<2x8x16xf32> to vector<2x16xf32>
    %9 = vector.shape_cast %8 : vector<2x16xf32> to vector<2x1x16xf32>
    %10 = vector.broadcast %9 : vector<2x1x16xf32> to vector<2x8x16xf32>
    %11 = arith.subf %7, %10 : vector<2x8x16xf32>
    %12 = math.exp %11 : vector<2x8x16xf32>
    %cst_8 = arith.constant dense<0.000000e+00> : vector<2x16xf32>
    %13 = vector.multi_reduction <add>, %12, %cst_8 [1] : vector<2x8x16xf32> to vector<2x16xf32>
    %14 = vector.shape_cast %13 : vector<2x16xf32> to vector<2x1x16xf32>
    %15 = tpu.reciprocal %14 : vector<2x1x16xf32> -> vector<2x1x16xf32>
    %16 = vector.broadcast %15 : vector<2x1x16xf32> to vector<2x8x16xf32>
    %17 = arith.mulf %12, %16 : vector<2x8x16xf32>
    %cst_9 = arith.constant dense<0.000000e+00> : vector<2x16x32xf32>
    %18 = tpu.matmul %17, %0, %cst_9 {dimension_numbers = #tpu.dot_dimension_numbers<[1], [1], [2], [2], [0, 0, 0, 2, 1, 2], [0], [0]>} : vector<2x8x16xf32>, vector<2x8x32xf32>, vector<2x16x32xf32> -> vector<2x16x32xf32>
    %c0_10 = arith.constant 0 : index
    %c0_11 = arith.constant 0 : index
    %c0_12 = arith.constant 0 : index
    %19 = vector.load %arg5[%c0_10, %c0_11, %c0_12] : memref<2x16x32xf32, #tpu.memory_space<vmem>>, vector<2x16x32xf32>
    tpu.vector_store %arg5[%c0_10, %c0_11, %c0_12], %18 {strides = array<i32>} : memref<2x16x32xf32, #tpu.memory_space<vmem>>, vector<2x16x32xf32>,
    %20 = vector.extract_strided_slice %17 {offsets = [0, 0, 0], sizes = [1, 8, 16], strides = [1, 1, 1]} : vector<2x8x16xf32> to vector<1x8x16xf32>
    %21 = vector.shape_cast %20 : vector<1x8x16xf32> to vector<8x16xf32>
    %22 = tpu.transpose %21, [1, 0] : vector<8x16xf32> -> vector<16x8xf32>
    %c0_13 = arith.constant 0 : index
    %c0_14 = arith.constant 0 : index
    %c0_15 = arith.constant 0 : index
    %23 = vector.load %arg6[%c0_13, %c0_14, %c0_15] : memref<2x16x8xf32, #tpu.memory_space<vmem>>, vector<1x16x8xf32>
    %24 = vector.shape_cast %23 : vector<1x16x8xf32> to vector<16x8xf32>
    %25 = vector.shape_cast %22 : vector<16x8xf32> to vector<1x16x8xf32>
    tpu.vector_store %arg6[%c0_13, %c0_14, %c0_15], %25 {strides = array<i32>} : memref<2x16x8xf32, #tpu.memory_space<vmem>>, vector<1x16x8xf32>,
    %26 = vector.extract_strided_slice %17 {offsets = [1, 0, 0], sizes = [1, 8, 16], strides = [1, 1, 1]} : vector<2x8x16xf32> to vector<1x8x16xf32>
    %27 = vector.shape_cast %26 : vector<1x8x16xf32> to vector<8x16xf32>
    %28 = tpu.transpose %27, [1, 0] : vector<8x16xf32> -> vector<16x8xf32>
    %c1 = arith.constant 1 : index
    %c0_16 = arith.constant 0 : index
    %c0_17 = arith.constant 0 : index
    %29 = vector.load %arg6[%c1, %c0_16, %c0_17] : memref<2x16x8xf32, #tpu.memory_space<vmem>>, vector<1x16x8xf32>
    %30 = vector.shape_cast %29 : vector<1x16x8xf32> to vector<16x8xf32>
    %31 = vector.shape_cast %28 : vector<16x8xf32> to vector<1x16x8xf32>
    tpu.vector_store %arg6[%c1, %c0_16, %c0_17], %31 {strides = array<i32>} : memref<2x16x8xf32, #tpu.memory_space<vmem>>, vector<1x16x8xf32>,
    return
  }
  func.func @transform_0(%arg0: i32, %arg1: i32) -> (i32, i32, i32) {
    %c0_i32 = arith.constant 0 : i32
    %c0_i32_0 = arith.constant 0 : i32
    %c0_i32_1 = arith.constant 0 : i32
    return %arg0, %c0_i32, %c0_i32_0 : i32, i32, i32
  }
  func.func @transform_1(%arg0: i32, %arg1: i32) -> (i32, i32) {
    %c0_i32 = arith.constant 0 : i32
    %c0_i32_0 = arith.constant 0 : i32
    %c0_i32_1 = arith.constant 0 : i32
    return %c0_i32, %c0_i32_0 : i32, i32
  }
  func.func @transform_2(%arg0: i32, %arg1: i32) -> (i32, i32) {
    %c0_i32 = arith.constant 0 : i32
    %c0_i32_0 = arith.constant 0 : i32
    return %arg1, %c0_i32 : i32, i32
  }
  func.func @transform_3(%arg0: i32, %arg1: i32) -> (i32, i32, i32) {
    %c0_i32 = arith.constant 0 : i32
    %c0_i32_0 = arith.constant 0 : i32
    return %arg0, %arg1, %c0_i32 : i32, i32, i32
  }
  func.func @transform_4(%arg0: i32, %arg1: i32) -> (i32, i32, i32) {
    %c0_i32 = arith.constant 0 : i32
    %c0_i32_0 = arith.constant 0 : i32
    return %arg0, %arg1, %c0_i32 : i32, i32, i32
  }
}

module attributes {stable_mosaic.version = 11 : i64} {
  func.func @_lwa_kernel(%arg0: i32, %arg1: i32, %arg2: memref<2x8x32xf32, #tpu.memory_space<vmem>>, %arg3: memref<32x32xf32, #tpu.memory_space<vmem>>, %arg4: memref<16x32xf32, #tpu.memory_space<vmem>>, %arg5: memref<2x16x32xf32, #tpu.memory_space<vmem>>, %arg6: memref<2x16x8xf32, #tpu.memory_space<vmem>>, %arg7: memref<16x32xf32, #tpu.memory_space<vmem>>) attributes {dimension_semantics = [#tpu.dimension_semantics<parallel>, #tpu.dimension_semantics<arbitrary>], iteration_bounds = array<i64: 2, 1>, scalar_prefetch = 0 : i64, scratch_operands = 1 : i64, tpu.core_type = #tpu.core_type<tc>, window_params = [{transform_indices = @transform_0, window_bounds = array<i64: 2, 8, 32>}, {pipeline_mode = #tpu.pipeline_mode<synchronous>, transform_indices = @transform_1, window_bounds = array<i64: 32, 32>}, {transform_indices = @transform_2, window_bounds = array<i64: 16, 32>}, {transform_indices = @transform_3, window_bounds = array<i64: 2, 16, 32>}, {transform_indices = @transform_4, window_bounds = array<i64: 2, 16, 8>}]} {
    %c0 = arith.constant 0 : index
    %c0_0 = arith.constant 0 : index
    %c0_1 = arith.constant 0 : index
    %0 = vector.load %arg2[%c0, %c0_0, %c0_1] : memref<2x8x32xf32, #tpu.memory_space<vmem>>, vector<2x8x32xf32>
    %c0_i32 = arith.constant 0 : i32
    %1 = arith.cmpi eq, %arg1, %c0_i32 : i32
    %2 = arith.extui %1 : i1 to i32
    %c0_i32_2 = arith.constant 0 : i32
    %3 = arith.cmpi ne, %2, %c0_i32_2 : i32
    scf.if %3 {
      %32 = vector.shape_cast %0 : vector<2x8x32xf32> to vector<16x32xf32>
      %c0_18 = arith.constant 0 : index
      %c0_19 = arith.constant 0 : index
      %33 = vector.load %arg3[%c0_18, %c0_19] : memref<32x32xf32, #tpu.memory_space<vmem>>, vector<32x32xf32>
      %cst_20 = arith.constant dense<0.000000e+00> : vector<16x32xf32>
      %34 = tpu.matmul %32, %33, %cst_20 {dimension_numbers = #tpu.dot_dimension_numbers<[1], [1], [0], [0], [0, 0, 1, 0], [], []>} : vector<16x32xf32>, vector<32x32xf32>, vector<16x32xf32> -> vector<16x32xf32>
      %35 = math.tanh %34 : vector<16x32xf32>
      %c0_21 = arith.constant 0 : index
      %c0_22 = arith.constant 0 : index
      %36 = vector.load %arg7[%c0_21, %c0_22] : memref<16x32xf32, #tpu.memory_space<vmem>>, vector<16x32xf32>
      tpu.vector_store %arg7[%c0_21, %c0_22], %35 {strides = array<i32>} : memref<16x32xf32, #tpu.memory_space<vmem>>, vector<16x32xf32>,
    } else {
    }
    %c0_3 = arith.constant 0 : index
    %c0_4 = arith.constant 0 : index
    %4 = vector.load %arg7[%c0_3, %c0_4] : memref<16x32xf32, #tpu.memory_space<vmem>>, vector<16x32xf32>
    %c0_5 = arith.constant 0 : index
    %c0_6 = arith.constant 0 : index
    %5 = vector.load %arg4[%c0_5, %c0_6] : memref<16x32xf32, #tpu.memory_space<vmem>>, vector<16x32xf32>
    %cst = arith.constant dense<0.000000e+00> : vector<16x16xf32>
    %6 = tpu.matmul %4, %5, %cst {dimension_numbers = #tpu.dot_dimension_numbers<[1], [1], [0], [0], [0, 0, 1, 0], [], []>} : vector<16x32xf32>, vector<16x32xf32>, vector<16x16xf32> -> vector<16x16xf32>
    %7 = vector.shape_cast %6 : vector<16x16xf32> to vector<2x8x16xf32>
    %cst_7 = arith.constant dense<0xFF800000> : vector<2x16xf32>
    %8 = vector.multi_reduction <maximumf>, %7, %cst_7 [1] : vector<2x8x16xf32> to vector<2x16xf32>
    %9 = vector.shape_cast %8 : vector<2x16xf32> to vector<2x1x16xf32>
    %10 = vector.broadcast %9 : vector<2x1x16xf32> to vector<2x8x16xf32>
    %11 = arith.subf %7, %10 : vector<2x8x16xf32>
    %12 = math.exp %11 : vector<2x8x16xf32>
    %cst_8 = arith.constant dense<0.000000e+00> : vector<2x16xf32>
    %13 = vector.multi_reduction <add>, %12, %cst_8 [1] : vector<2x8x16xf32> to vector<2x16xf32>
    %14 = vector.shape_cast %13 : vector<2x16xf32> to vector<2x1x16xf32>
    %15 = tpu.reciprocal %14 : vector<2x1x16xf32> -> vector<2x1x16xf32>
    %16 = vector.broadcast %15 : vector<2x1x16xf32> to vector<2x8x16xf32>
    %17 = arith.mulf %12, %16 : vector<2x8x16xf32>
    %cst_9 = arith.constant dense<0.000000e+00> : vector<2x16x32xf32>
    %18 = tpu.matmul %17, %0, %cst_9 {dimension_numbers = #tpu.dot_dimension_numbers<[1], [1], [2], [2], [0, 0, 0, 2, 1, 2], [0], [0]>} : vector<2x8x16xf32>, vector<2x8x32xf32>, vector<2x16x32xf32> -> vector<2x16x32xf32>
    %c0_10 = arith.constant 0 : index
    %c0_11 = arith.constant 0 : index
    %c0_12 = arith.constant 0 : index
    %19 = vector.load %arg5[%c0_10, %c0_11, %c0_12] : memref<2x16x32xf32, #tpu.memory_space<vmem>>, vector<2x16x32xf32>
    tpu.vector_store %arg5[%c0_10, %c0_11, %c0_12], %18 {strides = array<i32>} : memref<2x16x32xf32, #tpu.memory_space<vmem>>, vector<2x16x32xf32>,
    %20 = vector.extract_strided_slice %17 {offsets = [0, 0, 0], sizes = [1, 8, 16], strides = [1, 1, 1]} : vector<2x8x16xf32> to vector<1x8x16xf32>
    %21 = vector.shape_cast %20 : vector<1x8x16xf32> to vector<8x16xf32>
    %22 = tpu.transpose %21, [1, 0] : vector<8x16xf32> -> vector<16x8xf32>
    %c0_13 = arith.constant 0 : index
    %c0_14 = arith.constant 0 : index
    %c0_15 = arith.constant 0 : index
    %23 = vector.load %arg6[%c0_13, %c0_14, %c0_15] : memref<2x16x8xf32, #tpu.memory_space<vmem>>, vector<1x16x8xf32>
    %24 = vector.shape_cast %23 : vector<1x16x8xf32> to vector<16x8xf32>
    %25 = vector.shape_cast %22 : vector<16x8xf32> to vector<1x16x8xf32>
    tpu.vector_store %arg6[%c0_13, %c0_14, %c0_15], %25 {strides = array<i32>} : memref<2x16x8xf32, #tpu.memory_space<vmem>>, vector<1x16x8xf32>,
    %26 = vector.extract_strided_slice %17 {offsets = [1, 0, 0], sizes = [1, 8, 16], strides = [1, 1, 1]} : vector<2x8x16xf32> to vector<1x8x16xf32>
    %27 = vector.shape_cast %26 : vector<1x8x16xf32> to vector<8x16xf32>
    %28 = tpu.transpose %27, [1, 0] : vector<8x16xf32> -> vector<16x8xf32>
    %c1 = arith.constant 1 : index
    %c0_16 = arith.constant 0 : index
    %c0_17 = arith.constant 0 : index
    %29 = vector.load %arg6[%c1, %c0_16, %c0_17] : memref<2x16x8xf32, #tpu.memory_space<vmem>>, vector<1x16x8xf32>
    %30 = vector.shape_cast %29 : vector<1x16x8xf32> to vector<16x8xf32>
    %31 = vector.shape_cast %28 : vector<16x8xf32> to vector<1x16x8xf32>
    tpu.vector_store %arg6[%c1, %c0_16, %c0_17], %31 {strides = array<i32>} : memref<2x16x8xf32, #tpu.memory_space<vmem>>, vector<1x16x8xf32>,
    return
  }
  func.func @transform_0(%arg0: i32, %arg1: i32) -> (i32, i32, i32) {
    %c0_i32 = arith.constant 0 : i32
    %c0_i32_0 = arith.constant 0 : i32
    %c0_i32_1 = arith.constant 0 : i32
    return %arg0, %c0_i32, %c0_i32_0 : i32, i32, i32
  }
  func.func @transform_1(%arg0: i32, %arg1: i32) -> (i32, i32) {
    %c0_i32 = arith.constant 0 : i32
    %c0_i32_0 = arith.constant 0 : i32
    %c0_i32_1 = arith.constant 0 : i32
    return %c0_i32, %c0_i32_0 : i32, i32
  }
  func.func @transform_2(%arg0: i32, %arg1: i32) -> (i32, i32) {
    %c0_i32 = arith.constant 0 : i32
    %c0_i32_0 = arith.constant 0 : i32
    return %arg1, %c0_i32 : i32, i32
  }
  func.func @transform_3(%arg0: i32, %arg1: i32) -> (i32, i32, i32) {
    %c0_i32 = arith.constant 0 : i32
    %c0_i32_0 = arith.constant 0 : i32
    return %arg0, %arg1, %c0_i32 : i32, i32, i32
  }
  func.func @transform_4(%arg0: i32, %arg1: i32) -> (i32, i32, i32) {
    %c0_i32 = arith.constant 0 : i32
    %c0_i32_0 = arith.constant 0 : i32
    return %arg0, %arg1, %c0_i32 : i32, i32, i32
  }
}

</mosaic_0001>

<bundles_post_ra>
// kernel: tpu_custom_call.1
= control target key start
LH: loop header
LB: loop body
LE: loop exit
PB: predicated region body
PF: predicated region fallthrough
CT: control target
= control target key end

     0   :  { %10 = vsyncpa [#allocation4], 0  ;;  %s1567_s0 = inlined_call_operand.hbm [shape: f32[4,8,32], index: 0, kind: input, shape index: {}]   ;;  %s1568_s1 = inlined_call_operand.hbm [shape: f32[32,32], index: 1, kind: input, shape index: {}]   ;;  %s1569_s2 = inlined_call_operand.hbm [shape: f32[16,32], index: 2, kind: input, shape index: {}]   ;;  %s1570_s3 = inlined_call_operand.hbm [shape: f32[4,16,32], index: 3, kind: output, shape index: {0}]   ;;  %s1571_s4 = inlined_call_operand.vmem [shape: f32[4,16,8], index: 4, kind: output, shape index: {1}]  }
   0x1   :  { %12 = vsyncpa [#allocation4 + $0x1], 0 }
   0x2   :  { %13 = vsyncpa [#allocation7], 0 }
   0x3   :  { %14 = vsyncpa [#allocation5], 0 }
   0x4   :  { %16 = vsyncpa [#allocation5 + $0x1], 0  ;;  %s1334_s15 = smov 0   ;;  %s1336_s16 = smov 0  }
   0x5   :  { %s1338_s17 = smov 0   ;;  %s1340_s18 = smov 0  }
   0x6   :  { %s1342_s19 = smov 0   ;;  %s1344_s20 = smov 0  }
   0x7 LB: > { %s948_s21 = sadd.s32 4294967295, %s1299_s20   ;;  %s949_s22 = sadd.s32 4294967294, %s1299_s20   ;;  %s1299_s20 = sphi %s1344_s20, %s22_s20   ;;  %s1295_s19 = sphi %s1342_s19, %s1590_s19   ;;  %s1291_s18 = sphi %s1340_s18, %s1589_s18   ;;  %s1287_s17 = sphi %s1338_s17, %s1588_s17   ;;  %s1283_s16 = sphi %s1336_s16, %s1587_s16   ;;  %s1279_s15 = sphi %s1334_s15, %s1586_s15  }
   0x8   : > { %p54_p0 = scmp.ne.s32.totalorder %s1283_s16, %s1279_s15  ;;  %p1368_p1 = scmp.eq.s32.totalorder %s948_s21, 0 }
   0x9   : > { %p1372_p2 = scmp.eq.s32.totalorder %s948_s21, 1  ;;  %p133_p3 = scmp.eq.s32.totalorder %s949_s22, 1 }
   0xa   : > { %p1378_p4 = por %p1368_p1, %p54_p0  ;;  %p950_p5 = scmp.ge.s32.totalorder %s1299_s20, 1 }
   0xb   : > { %p1383_p6 = por %p133_p3, %p54_p0  ;;  %p168_p7 = scmp.lt.s32.totalorder %s1299_s20, 3 }
   0xc   : > { %s1301_s28 = smov [#allocation6]   ;;  %s1302_s5 = smov [#allocation8]  }
   0xd   : > { %s1577_s26 = scalar_select %p1383_p6, 1, 0 }
   0xe   : > { %p1388_p8 = pnand %p950_p5, %p168_p7  ;;  %s180_s29 = sshll.u32 %s1301_s28, 4  ;;  %s181_s29 = int_to_ptr.vmem [resolvable:$true] %s180_s29 }
   0xf   : > { %s196_s6 = sshll.u32 %s1302_s5, 4  ;;  %s1146_s7 = scalar_lea.vmem %s181_s29, 512  ;;  %s197_s6 = int_to_ptr.vmem [resolvable:$true] %s196_s6 }
  0x10   : > { %p1047_p9 = pneg %p1388_p8  ;;  %p1147_p13 = scmp.ne.s32.totalorder %s181_s29, %s1146_s7 }
  0x11   : > { %p1154_p5 = scmp.lt.s32.totalorder %s181_s29, %s181_s29  ;;  %p1155_p7 = scmp.lt.s32.totalorder %s1146_s7, %s1146_s7 }
  0x12   : > { %p1397_p11 = pnand %p1047_p9, %p1368_p1 }
  0x13   : > { %p1156_p10 = por %p1155_p7, %p1154_p5 }
  0x14   : > { %p1137_p12 = pneg %p1397_p11 }
  0x16   : > { %p1149_p0 = pnand %p1147_p13, %p1137_p12 }
  0x18   : > { %p1150_p3 = pneg %p1149_p0 }
  0x1a   : > { %p1157_p9 = pnand %p1156_p10, %p1150_p3 }
  0x1c   : > { %1160 = shalt.err (!%p1157_p9)
}
  0x1d   : > { %s1572_s8 = smov 128   ;;  %s1573_s9 = smov 8  }
  0x1e   : > { %1050 = dma.hbm_to_vmem [thread:$0]  (!%p1397_p11), %s1568_s1, 512, %s181_s29, [#allocation7], %s1572_s8, %s1572_s8, %s1573_s9  }
  0x1f   : > { %s1172_s12 = scalar_lea.vmem %s197_s6, 256  ;;  %p1180_p10 = scmp.lt.s32.totalorder %s197_s6, %s197_s6 }
  0x20   : > { %p1173_p13 = scmp.ne.s32.totalorder %s197_s6, %s1172_s12  ;;  %p1181_p3 = scmp.lt.s32.totalorder %s1172_s12, %s1172_s12 }
  0x22   : > { %p1175_p0 = pnand %p1173_p13, %p1137_p12  ;;  %p1182_p7 = por %p1181_p3, %p1180_p10 }
  0x24   : > { %p1176_p5 = pneg %p1175_p0 }
  0x26   : > { %p1183_p9 = pnand %p1182_p7, %p1176_p5 }
  0x28   : > { %1186 = shalt.err (!%p1183_p9)
}
  0x29   : > { %1053 = dma.hbm_to_vmem [thread:$0]  (!%p1397_p11), %s1569_s2, 256, %s197_s6, [#allocation7], %s1572_s8, %s1572_s8, %s1573_s9  }
  0x2a   : > { %s34_s21 = sadd.s32 1, %s1295_s19  ;;  %s41_s22 = sadd.s32 1, %s1287_s17 }
  0x2b   : > { %p36_p12 = scmp.ge.s32.totalorder %s34_s21, 2  ;;  %p48_p13 = scmp.ne.s32.totalorder %s1287_s17, %s1283_s16 }
  0x2c   : > { %p49_p0 = scmp.eq.s32.totalorder %s1299_s20, 0  ;;  %p1064_p5 = scmp.lt.s32.totalorder %s1299_s20, 2 }
  0x2d   : > { %s1592_s21 = smov (%p36_p12, %s34_s21), 0  ;;  %p1435_p3 = por %p1372_p2, %p48_p13 }
  0x2e   : > { %p50_p10 = por %p49_p0, %p48_p13  ;;  %s38_s29 = ssub.s32 %s1295_s19, %s1592_s21 }
  0x2f   : > { %s210_s30 = sand.u32 1, %s1287_s17   ;;  %p39_p7 = scmp.eq.s32.totalorder %s38_s29, 0 }
  0x30   : > { %s954_s5 = sshll.u32 %s210_s30, 4  ;;  %s987_s6 = sshll.u32 %s1295_s19, 8 }
  0x31   : > { %s1444_s7 = scalar_select %p39_p7, %s1287_s17, %s41_s22  }
  0x32   : > { %s220_s12 = scalar_lea.hbm %s1567_s0, %s987_s6  ;;  %s214_s13 = scalar_lea.vmem [#allocation3], %s954_s5 }
  0x33   : > { %s221_s14 = sshll.u32 %s214_s13, 4  ;;  %p1451_p11 = pnand %p1064_p5, %p50_p10  ;;  %s222_s14 = int_to_ptr.vmem [resolvable:$true] %s221_s14 }
  0x34   : > { %s211_s8 = scalar_lea.sflag [#allocation4], %s210_s30  ;;  %s1200_s29 = scalar_lea.vmem %s222_s14, 256 }
  0x35   : > { %p1189_p2 = pneg %p1451_p11  ;;  %p1201_p9 = scmp.ne.s32.totalorder %s222_s14, %s1200_s29 }
  0x36   : > { %s1305_s22 = smov [#allocation3]  }
  0x37   : > { %p1203_p12 = pnand %p1201_p9, %p1189_p2  ;;  %s1205_s9 = sshll.u32 %s1305_s22, 4  ;;  %s1206_s9 = int_to_ptr.vmem [resolvable:$false] %s1205_s9 }
  0x38   : > { %s1207_s6 = scalar_lea.vmem %s1206_s9, 512  ;;  %p1208_p0 = scmp.lt.s32.totalorder %s222_s14, %s1206_s9 }
  0x39   : > { %p1204_p13 = pneg %p1203_p12  ;;  %p1209_p7 = scmp.lt.s32.totalorder %s1207_s6, %s1200_s29 }
  0x3b   : > { %p1210_p6 = por %p1209_p7, %p1208_p0 }
  0x3d   : > { %p1211_p5 = pnand %p1210_p6, %p1204_p13 }
  0x3f   : > { %1214 = shalt.err (!%p1211_p5)
}
  0x40   : > { %s1582_s5 = smov 8   ;;  %s1583_s10 = smov 128  }
  0x41   : > { %1057 = dma.hbm_to_vmem [thread:$0]  (!%p1451_p11), %s220_s12, 256, %s222_s14, %s211_s8, %s1583_s10, %s1583_s10, %s1582_s5  }
  0x42   : > { %233 = sbr.rel (%p1388_p8) target bundleno = 910 (0x38e), region = 32  ;;  %s1465_s30 = sand.u32 (!%p1388_p8), 1, %s1283_s16  }
  0x43   : > { %s958_s9 = sshll.u32 (!%p1388_p8), %s1465_s30, 4  ;;  %s236_s11 = scalar_lea.sflag (!%p1388_p8), [#allocation4], %s1465_s30 }
  0x44   : > { %s239_s13 = scalar_lea.vmem (!%p1388_p8), [#allocation3], %s958_s9 }
  0x47   : > { %1266 = dma.done.wait (%p1378_p4), %s236_s11, 256  }
  0x48   : > { %1268 = vsyncadd (%p1378_p4), %s236_s11, 4294967040 }
  0x49   : > { %1270 = dma.done.wait (%p1368_p1), [#allocation7], 768  }
  0x4a   : > { %1272 = vsyncadd (%p1368_p1), [#allocation7], 4294966528  ;;  %vm308_vm0 = vcmask 261120   ;;  %v307_v0 = vld [vmem:[#allocation6 + $0x18] sm:$0xff]  ;;  %v306_v1 = vld [vmem:[#allocation6 + $0x10] sm:$0xff]  ;;  %vm498_vm1 = vcmask 130048  }
  0x4b   : > { %1007 = vmatprep.subr.msk.mxu0 %vm308_vm0, %v307_v0  ;;  %v298_v2 = vld [vmem:[%s239_s13] sm:$0xff]  ;;  %v305_v3 = vld [vmem:[#allocation6 + $0x8] sm:$0xff]  ;;  %s962_s23 = sshll.u32 %s1291_s18, 1  ;;  %vm569_vm2 = vcmask 64512   ;;  %s961_s14 = sshll.u32 %s1465_s30, 5 }
  0x4c   : > { %1008 = vmatpush3.xpose.msk.msra.mxu0 %vm308_vm0, %v307_v0  ;;  %1015 = vmatprep.mubr.msk.f32.mxu0 %vm308_vm0, %v298_v2  ;;  %v304_v4 = vld [vmem:[#allocation6] sm:$0xff]  ;;  %v1486_v5 = vld [vmem:[%s239_s13 + $0x8] sm:$0xff]  ;;  %p288_p1 = scmp.lt.s32.totalorder %s962_s23, 3  ;;  %s269_s24 = scalar_lea.vmem [#allocation9], %s961_s14 }
  0x4d   : > { %1009 = vmatprep.subr.msk.mxu0 %vm308_vm0, %v306_v1  ;;  %v409_v6 = vld [vmem:[#allocation8 + $0x8] sm:$0xff]  ;;  %v408_v7 = vld [vmem:[#allocation8] sm:$0xff]  ;;  %s800_s29 = sshll.u32 %s269_s24, 4  ;;  %s990_s22 = sshll.u32 %s1291_s18, 9  ;;  %s1512_s29 = int_to_ptr.vmem [resolvable:$true] %s800_s29 }
  0x4e   : > { %1018 = vmatprep.subr.msk.mxu1 %vm308_vm0, %v409_v6  ;;  %s1594_s23 = smov (!%p288_p1, %s962_s23), 3  ;;  %s1517_s10 = scalar_lea.hbm %s1570_s3, %s990_s22 }
  0x4f   : > { %1019 = vmatpush3.xpose.msk.msra.mxu1 %vm308_vm0, %v409_v6  ;;  %s988_s25 = sshll.u32 %s1594_s23, 4  ;;  %s774_s9 = scalar_lea.sflag [#allocation5], %s1465_s30 }
  0x50   : > { %1010 = vmatpush3.xpose.msk.msra.mxu0 %vm308_vm0, %v306_v1  ;;  %1020 = vmatprep.subr.msk.mxu1 %vm308_vm0, %v408_v7  ;;  %s295_s12 = scalar_lea.vmem %s1571_s4, %s988_s25  ;;  %s1215_s11 = scalar_lea.vmem %s1512_s29, 512 }
  0x51   : > { %1011 = vmatprep.subr.msk.mxu0 %vm308_vm0, %v305_v3  ;;  %p1216_p4 = scmp.ne.s32.totalorder %s1512_s29, %s1215_s11  ;;  %s1306_s18 = smov [#allocation9]  }
  0x52   : > { %s1219_s13 = sshll.u32 %s1306_s18, 4  ;;  %s1220_s13 = int_to_ptr.vmem [resolvable:$false] %s1219_s13 }
  0x53   : > { %1021 = vmatpush3.xpose.msk.msra.mxu1 %vm308_vm0, %v408_v7  ;;  %p1217_p6 = pnand %p1216_p4, %p1435_p3  ;;  %s1221_s23 = scalar_lea.vmem %s1220_s13, 1024 }
  0x54   : > { %1012 = vmatpush3.xpose.msk.msra.mxu0 %vm308_vm0, %v305_v3  ;;  %1025 = vmatprep.subr.mxu1 %v298_v2  ;;  %p1222_p10 = scmp.lt.s32.totalorder %s1512_s29, %s1220_s13  ;;  %p1223_p11 = scmp.lt.s32.totalorder %s1221_s23, %s1215_s11 }
  0x55   : > { %1013 = vmatprep.subr.msk.mxu0 %vm308_vm0, %v304_v4  ;;  %p1218_p8 = pneg %p1217_p6 }
  0x56   : > { %p1224_p2 = por %p1223_p11, %p1222_p10 }
  0x58   : > { %1014 = vmatpush3.xpose.msk.msra.mxu0 %vm308_vm0, %v304_v4  ;;  %p1225_p9 = pnand %p1224_p2, %p1218_p8 }
  0x5b   : > { %1016 = vmatmul.mubr.msk.f32.vlgmr.msra.gmra.mxu0 %vm308_vm0, %v1486_v5 }
 0x11b   : > { %v1017_v8 = vpop.f32.mrf.mxu0 }
 0x11c   : > { %1123 = vtanh.f32 %v1017_v8 }
 0x11d   : > { %v393_v9 = vpop.f32.mrf.mxu0 }
 0x11e   : > { %1125 = vtanh.f32 %v393_v9 }
 0x129   : > { %v1124_v10 = vpop.eup %1123 }
 0x12a   : > { %405 = vst.msk [vmem:[#allocation2 + $0x8] sm:$0xff] %vm308_vm0, %v1124_v10 }
 0x12b   : > { %v1126_v11 = vpop.eup %1125 }
 0x12c   : > { %404 = vst.msk [vmem:[#allocation2] sm:$0xff] %vm308_vm0, %v1126_v11 }
 0x131   : > { %v407_v13 = vld [vmem:[#allocation2 + $0x8] sm:$0xff] }
 0x133   : > { %v406_v12 = vld [vmem:[#allocation2] sm:$0xff] }
 0x134   : > { %1022 = vmatprep.mubr.msk.f32.mxu1 %vm308_vm0, %v406_v12 }
 0x135   : > { %1023 = vmatmul.mubr.msk.f32.vlgmr.msra.gmra.mxu1 %vm308_vm0, %v407_v13 }
 0x136   : > { %1026 = vmatpush3.msra.mxu1 %v298_v2 }
 0x137   : > { %1030 = vmatprep.subr.mxu1 %v1486_v5 }
 0x1f5   : > { %v1024_v14 = vpop.f32.mrf.mxu1 }
 0x1f6   : > { %v506_v15 = vsel %vm498_vm1, %v1024_v14, -inf }
 0x1f7   : > { %v507_v16 = vrot.slane %v506_v15, 4  ;;  %v489_v17 = vpop.f32.mrf.mxu1 }
 0x1f8   : > { %v499_v18 = vsel %vm498_vm1, %v489_v17, -inf }
 0x1f9   : > { %v508_v19 = vmax.f32 %v506_v15, %v507_v16  ;;  %v500_v20 = vrot.slane %v499_v18, 4 }
 0x1fb   : > { %v509_v21 = vrot.slane %v508_v19, 2  ;;  %v501_v22 = vmax.f32 %v499_v18, %v500_v20 }
 0x1fd   : > { %v510_v23 = vmax.f32 %v508_v19, %v509_v21  ;;  %v502_v24 = vrot.slane %v501_v22, 2 }
 0x1ff   : > { %v511_v25 = vrot.slane %v510_v23, 1  ;;  %v503_v26 = vmax.f32 %v501_v22, %v502_v24 }
 0x201   : > { %v512_v27 = vmax.f32 %v510_v23, %v511_v25  ;;  %v504_v28 = vrot.slane %v503_v26, 1 }
 0x203   : > { %v514_v29 = vsub.f32 %v1024_v14, %v512_v27  ;;  %v505_v30 = vmax.f32 %v503_v26, %v504_v28 }
 0x205   : > { %v517_v31 = vmul.f32 1.442695, %v514_v29  ;;  %v513_v32 = vsub.f32 %v489_v17, %v505_v30 }
 0x207   : > { %1127 = vpow2.f32 %v517_v31  ;;  %v515_v33 = vmul.f32 1.442695, %v513_v32 }
 0x209   : > { %1129 = vpow2.f32 %v515_v33 }
 0x214   : > { %v1128_v34 = vpop.eup %1127 }
 0x215   : > { %v526_v35 = vsel %vm498_vm1, %v1128_v34, 0.0 }
 0x216   : > { %v1130_v36 = vpop.eup %1129  ;;  %v527_v37 = vrot.slane %v526_v35, 4 }
 0x217   : > { %v519_v38 = vsel %vm498_vm1, %v1130_v36, 0.0 }
 0x218   : > { %v528_v39 = vadd.f32 %v527_v37, %v526_v35  ;;  %v520_v40 = vrot.slane %v519_v38, 4 }
 0x21a   : > { %v529_v41 = vrot.slane %v528_v39, 2  ;;  %v521_v42 = vadd.f32 %v520_v40, %v519_v38 }
 0x21c   : > { %v530_v43 = vadd.f32 %v529_v41, %v528_v39  ;;  %v522_v44 = vrot.slane %v521_v42, 2 }
 0x21e   : > { %v523_v45 = vadd.f32 %v522_v44, %v521_v42  ;;  %v531_v46 = vrot.slane %v530_v43, 1 }
 0x220   : > { %v524_v47 = vrot.slane %v523_v45, 1  ;;  %v532_v49 = vadd.f32 %v531_v46, %v530_v43 }
 0x222   : > { %v525_v48 = vadd.f32 %v524_v47, %v523_v45 }
 0x224   : > { %1131 = vrcp.f32 %v525_v48 }
 0x225   : > { %1133 = vrcp.f32 %v532_v49 }
 0x231   : > { %v1132_v50 = vpop.eup %1131 }
 0x232   : > { %v535_v51 = vmul.f32 %v1132_v50, %v1130_v36  ;;  %v1134_v52 = vpop.eup %1133 }
 0x233   : > { %v536_v53 = vmul.f32 %v1134_v52, %v1128_v34 }
 0x234   : > { %537 = vxpose.xlu0.b32.start.end [1/1] (short) (narrow) %v535_v51, 16 }
 0x239   : > { %651 = vxpose.xlu0.b32.start.end [1/1] (short) (narrow) %v536_v53, 16 }
 0x2b0   : > { %v553_v54 = vpop.trf.xlu0 }
 0x2b1   : > { %768 = vst.msk [vmem:[%s295_s12] sm:$0xff] %vm569_vm2, %v553_v54  ;;  %1027 = vmatprep.mubr.msk.f32.mxu1 %vm569_vm2, %v553_v54 }
 0x2b4   : > { %v554_v55 = vpop.trf.xlu0 }
 0x2b5   : > { %769 = vst.msk [vmem:[%s295_s12 + $0x8] sm:$0xff] %vm569_vm2, %v554_v55  ;;  %1028 = vmatmul.mubr.msk.f32.vlgmr.msra.gmra.mxu1 %vm569_vm2, %v554_v55 }
 0x2b6   : > { %1031 = vmatpush3.msra.mxu1 %v1486_v5 }
 0x2b8   : > { %v667_v56 = vpop.trf.xlu0 }
 0x2b9   : > { %979 = vst.msk [vmem:[%s295_s12 + $0x10] sm:$0xff] %vm569_vm2, %v667_v56  ;;  %1032 = vmatprep.mubr.msk.f32.mxu1 %vm569_vm2, %v667_v56 }
 0x2bc   : > { %v668_v57 = vpop.trf.xlu0 }
 0x2bd   : > { %980 = vst.msk [vmem:[%s295_s12 + $0x18] sm:$0xff] %vm569_vm2, %v668_v57  ;;  %1033 = vmatmul.mubr.msk.f32.vlgmr.msra.gmra.mxu1 %vm569_vm2, %v668_v57 }
 0x375   : > { %v1029_v58 = vpop.f32.mrf.mxu1 }
 0x376   : > { %765 = vst.msk [vmem:[%s269_s24 + $0x8] sm:$0xff] %vm308_vm0, %v1029_v58 }
 0x377   : > { %v642_v59 = vpop.f32.mrf.mxu1 }
 0x378   : > { %764 = vst.msk [vmem:[%s269_s24] sm:$0xff] %vm308_vm0, %v642_v59 }
 0x37d   : > { %v1034_v60 = vpop.f32.mrf.mxu1 }
 0x37e   : > { %767 = vst.msk [vmem:[%s269_s24 + $0x18] sm:$0xff] %vm308_vm0, %v1034_v60 }
 0x37f   : > { %v755_v61 = vpop.f32.mrf.mxu1 }
 0x380   : > { %766 = vst.msk [vmem:[%s269_s24 + $0x10] sm:$0xff] %vm308_vm0, %v755_v61 }
 0x381   : > { %1228 = shalt.err (!%p1225_p9)
}
 0x382   : > { %s1229_s25 = scalar_lea.hbm %s1517_s10, 512  ;;  %s1233_s12 = scalar_lea.hbm %s1570_s3, 1024 }
 0x383   : > { %p1230_p12 = scmp.ne.s32.totalorder %s1517_s10, %s1229_s25  ;;  %p1234_p7 = scmp.lt.s32.totalorder %s1517_s10, %s1570_s3 }
 0x384   : > { %p1235_p5 = scmp.lt.s32.totalorder %s1233_s12, %s1229_s25 }
 0x385   : > { %p1231_p13 = pnand %p1230_p12, %p1435_p3 }
 0x386   : > { %p1236_p1 = por %p1235_p5, %p1234_p7 }
 0x387   : > { %p1232_p0 = pneg %p1231_p13 }
 0x389   : > { %p1237_p4 = pnand %p1236_p1, %p1232_p0 }
 0x38b   : > { %1240 = shalt.err (!%p1237_p4)
}
 0x38c   : > { %s1307_s22 = smov 128   ;;  %s1308_s6 = smov 8  }
 0x38d   : > { %1045 = dma.vmem_to_hbm [thread:$0]  (%p1435_p3), %s1512_s29, 512, %s1517_s10, %s774_s9, %s1307_s22, %s1307_s22, %s1308_s6  }
 0x38e PF: > { %s820_s5 = sand.u32 1, %s1279_s15   ;;  %p1584_p6 = scmp.ne.s32.totalorder %s1577_s26, 0 }
 0x38f   : > { %p1585_p8 = scmp.ge.s32.totalorder %s1299_s20, 2  ;;  %s821_s11 = scalar_lea.sflag [#allocation5], %s820_s5 }
 0x391   : > { %p1059_p10 = pnand %p1585_p8, %p1584_p6 }
 0x393   : > { %p1060_p11 = pneg %p1059_p10 }
 0x395   : > { %1274 = dma.done.wait (%p1060_p11), %s821_s11, 512  }
 0x396   : > { %1276 = vsyncadd (%p1060_p11), %s821_s11, 4294966784  ;;  %s22_s20 = sadd.s32 1, %s1299_s20   ;;  %s1586_s15 = smov %s1283_s16 }
 0x397   : > { %p19_p2 = scmp.ge.s32.totalorder %s22_s20, 4   ;;  %s1587_s16 = smov %s1287_s17 }
 0x398   : > { %s1588_s17 = smov %s1444_s7  ;;  %s1589_s18 = smov %s1295_s19 }
 0x399   : > { %s1590_s19 = smov %s1592_s21  ;;  %21 = sbr.rel (!%p19_p2) target bundleno = 7 (0x7), region = 103 }
 0x39e   :  { %839 = vsyncpa [#allocation4], 1 }
 0x39f   :  { %841 = vsyncpa [#allocation4 + $0x1], 1 }
 0x3a0   :  { %842 = vsyncpa [#allocation7], 1 }
 0x3a1   :  { %843 = vsyncpa [#allocation5], 1 }
 0x3a2   :  { %845 = vsyncpa [#allocation5 + $0x1], 1 }

// kernel: tpu_custom_call.1
= control target key start
LH: loop header
LB: loop body
LE: loop exit
PB: predicated region body
PF: predicated region fallthrough
CT: control target
= control target key end

     0   :  { %10 = vsyncpa [#allocation4], 0  ;;  %s1567_s0 = inlined_call_operand.hbm [shape: f32[4,8,32], index: 0, kind: input, shape index: {}]   ;;  %s1568_s1 = inlined_call_operand.hbm [shape: f32[32,32], index: 1, kind: input, shape index: {}]   ;;  %s1569_s2 = inlined_call_operand.hbm [shape: f32[16,32], index: 2, kind: input, shape index: {}]   ;;  %s1570_s3 = inlined_call_operand.hbm [shape: f32[4,16,32], index: 3, kind: output, shape index: {0}]   ;;  %s1571_s4 = inlined_call_operand.vmem [shape: f32[4,16,8], index: 4, kind: output, shape index: {1}]  }
   0x1   :  { %12 = vsyncpa [#allocation4 + $0x1], 0 }
   0x2   :  { %13 = vsyncpa [#allocation7], 0 }
   0x3   :  { %14 = vsyncpa [#allocation5], 0 }
   0x4   :  { %16 = vsyncpa [#allocation5 + $0x1], 0  ;;  %s1334_s15 = smov 0   ;;  %s1336_s16 = smov 0  }
   0x5   :  { %s1338_s17 = smov 0   ;;  %s1340_s18 = smov 0  }
   0x6   :  { %s1342_s19 = smov 0   ;;  %s1344_s20 = smov 0  }
   0x7 LB: > { %s948_s21 = sadd.s32 4294967295, %s1299_s20   ;;  %s949_s22 = sadd.s32 4294967294, %s1299_s20   ;;  %s1299_s20 = sphi %s1344_s20, %s22_s20   ;;  %s1295_s19 = sphi %s1342_s19, %s1590_s19   ;;  %s1291_s18 = sphi %s1340_s18, %s1589_s18   ;;  %s1287_s17 = sphi %s1338_s17, %s1588_s17   ;;  %s1283_s16 = sphi %s1336_s16, %s1587_s16   ;;  %s1279_s15 = sphi %s1334_s15, %s1586_s15  }
   0x8   : > { %p54_p0 = scmp.ne.s32.totalorder %s1283_s16, %s1279_s15  ;;  %p1368_p1 = scmp.eq.s32.totalorder %s948_s21, 0 }
   0x9   : > { %p1372_p2 = scmp.eq.s32.totalorder %s948_s21, 1  ;;  %p133_p3 = scmp.eq.s32.totalorder %s949_s22, 1 }
   0xa   : > { %p1378_p4 = por %p1368_p1, %p54_p0  ;;  %p950_p5 = scmp.ge.s32.totalorder %s1299_s20, 1 }
   0xb   : > { %p1383_p6 = por %p133_p3, %p54_p0  ;;  %p168_p7 = scmp.lt.s32.totalorder %s1299_s20, 3 }
   0xc   : > { %s1301_s28 = smov [#allocation6]   ;;  %s1302_s5 = smov [#allocation8]  }
   0xd   : > { %s1577_s26 = scalar_select %p1383_p6, 1, 0 }
   0xe   : > { %p1388_p8 = pnand %p950_p5, %p168_p7  ;;  %s180_s29 = sshll.u32 %s1301_s28, 4  ;;  %s181_s29 = int_to_ptr.vmem [resolvable:$true] %s180_s29 }
   0xf   : > { %s196_s6 = sshll.u32 %s1302_s5, 4  ;;  %s1146_s7 = scalar_lea.vmem %s181_s29, 512  ;;  %s197_s6 = int_to_ptr.vmem [resolvable:$true] %s196_s6 }
  0x10   : > { %p1047_p9 = pneg %p1388_p8  ;;  %p1147_p13 = scmp.ne.s32.totalorder %s181_s29, %s1146_s7 }
  0x11   : > { %p1154_p5 = scmp.lt.s32.totalorder %s181_s29, %s181_s29  ;;  %p1155_p7 = scmp.lt.s32.totalorder %s1146_s7, %s1146_s7 }
  0x12   : > { %p1397_p11 = pnand %p1047_p9, %p1368_p1 }
  0x13   : > { %p1156_p10 = por %p1155_p7, %p1154_p5 }
  0x14   : > { %p1137_p12 = pneg %p1397_p11 }
  0x16   : > { %p1149_p0 = pnand %p1147_p13, %p1137_p12 }
  0x18   : > { %p1150_p3 = pneg %p1149_p0 }
  0x1a   : > { %p1157_p9 = pnand %p1156_p10, %p1150_p3 }
  0x1c   : > { %1160 = shalt.err (!%p1157_p9)
}
  0x1d   : > { %s1572_s8 = smov 128   ;;  %s1573_s9 = smov 8  }
  0x1e   : > { %1050 = dma.hbm_to_vmem [thread:$0]  (!%p1397_p11), %s1568_s1, 512, %s181_s29, [#allocation7], %s1572_s8, %s1572_s8, %s1573_s9  }
  0x1f   : > { %s1172_s12 = scalar_lea.vmem %s197_s6, 256  ;;  %p1180_p10 = scmp.lt.s32.totalorder %s197_s6, %s197_s6 }
  0x20   : > { %p1173_p13 = scmp.ne.s32.totalorder %s197_s6, %s1172_s12  ;;  %p1181_p3 = scmp.lt.s32.totalorder %s1172_s12, %s1172_s12 }
  0x22   : > { %p1175_p0 = pnand %p1173_p13, %p1137_p12  ;;  %p1182_p7 = por %p1181_p3, %p1180_p10 }
  0x24   : > { %p1176_p5 = pneg %p1175_p0 }
  0x26   : > { %p1183_p9 = pnand %p1182_p7, %p1176_p5 }
  0x28   : > { %1186 = shalt.err (!%p1183_p9)
}
  0x29   : > { %1053 = dma.hbm_to_vmem [thread:$0]  (!%p1397_p11), %s1569_s2, 256, %s197_s6, [#allocation7], %s1572_s8, %s1572_s8, %s1573_s9  }
  0x2a   : > { %s34_s21 = sadd.s32 1, %s1295_s19  ;;  %s41_s22 = sadd.s32 1, %s1287_s17 }
  0x2b   : > { %p36_p12 = scmp.ge.s32.totalorder %s34_s21, 2  ;;  %p48_p13 = scmp.ne.s32.totalorder %s1287_s17, %s1283_s16 }
  0x2c   : > { %p49_p0 = scmp.eq.s32.totalorder %s1299_s20, 0  ;;  %p1064_p5 = scmp.lt.s32.totalorder %s1299_s20, 2 }
  0x2d   : > { %s1592_s21 = smov (%p36_p12, %s34_s21), 0  ;;  %p1435_p3 = por %p1372_p2, %p48_p13 }
  0x2e   : > { %p50_p10 = por %p49_p0, %p48_p13  ;;  %s38_s29 = ssub.s32 %s1295_s19, %s1592_s21 }
  0x2f   : > { %s210_s30 = sand.u32 1, %s1287_s17   ;;  %p39_p7 = scmp.eq.s32.totalorder %s38_s29, 0 }
  0x30   : > { %s954_s5 = sshll.u32 %s210_s30, 4  ;;  %s987_s6 = sshll.u32 %s1295_s19, 8 }
  0x31   : > { %s1444_s7 = scalar_select %p39_p7, %s1287_s17, %s41_s22  }
  0x32   : > { %s220_s12 = scalar_lea.hbm %s1567_s0, %s987_s6  ;;  %s214_s13 = scalar_lea.vmem [#allocation3], %s954_s5 }
  0x33   : > { %s221_s14 = sshll.u32 %s214_s13, 4  ;;  %p1451_p11 = pnand %p1064_p5, %p50_p10  ;;  %s222_s14 = int_to_ptr.vmem [resolvable:$true] %s221_s14 }
  0x34   : > { %s211_s8 = scalar_lea.sflag [#allocation4], %s210_s30  ;;  %s1200_s29 = scalar_lea.vmem %s222_s14, 256 }
  0x35   : > { %p1189_p2 = pneg %p1451_p11  ;;  %p1201_p9 = scmp.ne.s32.totalorder %s222_s14, %s1200_s29 }
  0x36   : > { %s1305_s22 = smov [#allocation3]  }
  0x37   : > { %p1203_p12 = pnand %p1201_p9, %p1189_p2  ;;  %s1205_s9 = sshll.u32 %s1305_s22, 4  ;;  %s1206_s9 = int_to_ptr.vmem [resolvable:$false] %s1205_s9 }
  0x38   : > { %s1207_s6 = scalar_lea.vmem %s1206_s9, 512  ;;  %p1208_p0 = scmp.lt.s32.totalorder %s222_s14, %s1206_s9 }
  0x39   : > { %p1204_p13 = pneg %p1203_p12  ;;  %p1209_p7 = scmp.lt.s32.totalorder %s1207_s6, %s1200_s29 }
  0x3b   : > { %p1210_p6 = por %p1209_p7, %p1208_p0 }
  0x3d   : > { %p1211_p5 = pnand %p1210_p6, %p1204_p13 }
  0x3f   : > { %1214 = shalt.err (!%p1211_p5)
}
  0x40   : > { %s1582_s5 = smov 8   ;;  %s1583_s10 = smov 128  }
  0x41   : > { %1057 = dma.hbm_to_vmem [thread:$0]  (!%p1451_p11), %s220_s12, 256, %s222_s14, %s211_s8, %s1583_s10, %s1583_s10, %s1582_s5  }
  0x42   : > { %233 = sbr.rel (%p1388_p8) target bundleno = 910 (0x38e), region = 32  ;;  %s1465_s30 = sand.u32 (!%p1388_p8), 1, %s1283_s16  }
  0x43   : > { %s958_s9 = sshll.u32 (!%p1388_p8), %s1465_s30, 4  ;;  %s236_s11 = scalar_lea.sflag (!%p1388_p8), [#allocation4], %s1465_s30 }
  0x44   : > { %s239_s13 = scalar_lea.vmem (!%p1388_p8), [#allocation3], %s958_s9 }
  0x47   : > { %1266 = dma.done.wait (%p1378_p4), %s236_s11, 256  }
  0x48   : > { %1268 = vsyncadd (%p1378_p4), %s236_s11, 4294967040 }
  0x49   : > { %1270 = dma.done.wait (%p1368_p1), [#allocation7], 768  }
  0x4a   : > { %1272 = vsyncadd (%p1368_p1), [#allocation7], 4294966528  ;;  %vm308_vm0 = vcmask 261120   ;;  %v307_v0 = vld [vmem:[#allocation6 + $0x18] sm:$0xff]  ;;  %v306_v1 = vld [vmem:[#allocation6 + $0x10] sm:$0xff]  ;;  %vm498_vm1 = vcmask 130048  }
  0x4b   : > { %1007 = vmatprep.subr.msk.mxu0 %vm308_vm0, %v307_v0  ;;  %v298_v2 = vld [vmem:[%s239_s13] sm:$0xff]  ;;  %v305_v3 = vld [vmem:[#allocation6 + $0x8] sm:$0xff]  ;;  %s962_s23 = sshll.u32 %s1291_s18, 1  ;;  %vm569_vm2 = vcmask 64512   ;;  %s961_s14 = sshll.u32 %s1465_s30, 5 }
  0x4c   : > { %1008 = vmatpush3.xpose.msk.msra.mxu0 %vm308_vm0, %v307_v0  ;;  %1015 = vmatprep.mubr.msk.f32.mxu0 %vm308_vm0, %v298_v2  ;;  %v304_v4 = vld [vmem:[#allocation6] sm:$0xff]  ;;  %v1486_v5 = vld [vmem:[%s239_s13 + $0x8] sm:$0xff]  ;;  %p288_p1 = scmp.lt.s32.totalorder %s962_s23, 3  ;;  %s269_s24 = scalar_lea.vmem [#allocation9], %s961_s14 }
  0x4d   : > { %1009 = vmatprep.subr.msk.mxu0 %vm308_vm0, %v306_v1  ;;  %v409_v6 = vld [vmem:[#allocation8 + $0x8] sm:$0xff]  ;;  %v408_v7 = vld [vmem:[#allocation8] sm:$0xff]  ;;  %s800_s29 = sshll.u32 %s269_s24, 4  ;;  %s990_s22 = sshll.u32 %s1291_s18, 9  ;;  %s1512_s29 = int_to_ptr.vmem [resolvable:$true] %s800_s29 }
  0x4e   : > { %1018 = vmatprep.subr.msk.mxu1 %vm308_vm0, %v409_v6  ;;  %s1594_s23 = smov (!%p288_p1, %s962_s23), 3  ;;  %s1517_s10 = scalar_lea.hbm %s1570_s3, %s990_s22 }
  0x4f   : > { %1019 = vmatpush3.xpose.msk.msra.mxu1 %vm308_vm0, %v409_v6  ;;  %s988_s25 = sshll.u32 %s1594_s23, 4  ;;  %s774_s9 = scalar_lea.sflag [#allocation5], %s1465_s30 }
  0x50   : > { %1010 = vmatpush3.xpose.msk.msra.mxu0 %vm308_vm0, %v306_v1  ;;  %1020 = vmatprep.subr.msk.mxu1 %vm308_vm0, %v408_v7  ;;  %s295_s12 = scalar_lea.vmem %s1571_s4, %s988_s25  ;;  %s1215_s11 = scalar_lea.vmem %s1512_s29, 512 }
  0x51   : > { %1011 = vmatprep.subr.msk.mxu0 %vm308_vm0, %v305_v3  ;;  %p1216_p4 = scmp.ne.s32.totalorder %s1512_s29, %s1215_s11  ;;  %s1306_s18 = smov [#allocation9]  }
  0x52   : > { %s1219_s13 = sshll.u32 %s1306_s18, 4  ;;  %s1220_s13 = int_to_ptr.vmem [resolvable:$false] %s1219_s13 }
  0x53   : > { %1021 = vmatpush3.xpose.msk.msra.mxu1 %vm308_vm0, %v408_v7  ;;  %p1217_p6 = pnand %p1216_p4, %p1435_p3  ;;  %s1221_s23 = scalar_lea.vmem %s1220_s13, 1024 }
  0x54   : > { %1012 = vmatpush3.xpose.msk.msra.mxu0 %vm308_vm0, %v305_v3  ;;  %1025 = vmatprep.subr.mxu1 %v298_v2  ;;  %p1222_p10 = scmp.lt.s32.totalorder %s1512_s29, %s1220_s13  ;;  %p1223_p11 = scmp.lt.s32.totalorder %s1221_s23, %s1215_s11 }
  0x55   : > { %1013 = vmatprep.subr.msk.mxu0 %vm308_vm0, %v304_v4  ;;  %p1218_p8 = pneg %p1217_p6 }
  0x56   : > { %p1224_p2 = por %p1223_p11, %p1222_p10 }
  0x58   : > { %1014 = vmatpush3.xpose.msk.msra.mxu0 %vm308_vm0, %v304_v4  ;;  %p1225_p9 = pnand %p1224_p2, %p1218_p8 }
  0x5b   : > { %1016 = vmatmul.mubr.msk.f32.vlgmr.msra.gmra.mxu0 %vm308_vm0, %v1486_v5 }
 0x11b   : > { %v1017_v8 = vpop.f32.mrf.mxu0 }
 0x11c   : > { %1123 = vtanh.f32 %v1017_v8 }
 0x11d   : > { %v393_v9 = vpop.f32.mrf.mxu0 }
 0x11e   : > { %1125 = vtanh.f32 %v393_v9 }
 0x129   : > { %v1124_v10 = vpop.eup %1123 }
 0x12a   : > { %405 = vst.msk [vmem:[#allocation2 + $0x8] sm:$0xff] %vm308_vm0, %v1124_v10 }
 0x12b   : > { %v1126_v11 = vpop.eup %1125 }
 0x12c   : > { %404 = vst.msk [vmem:[#allocation2] sm:$0xff] %vm308_vm0, %v1126_v11 }
 0x131   : > { %v407_v13 = vld [vmem:[#allocation2 + $0x8] sm:$0xff] }
 0x133   : > { %v406_v12 = vld [vmem:[#allocation2] sm:$0xff] }
 0x134   : > { %1022 = vmatprep.mubr.msk.f32.mxu1 %vm308_vm0, %v406_v12 }
 0x135   : > { %1023 = vmatmul.mubr.msk.f32.vlgmr.msra.gmra.mxu1 %vm308_vm0, %v407_v13 }
 0x136   : > { %1026 = vmatpush3.msra.mxu1 %v298_v2 }
 0x137   : > { %1030 = vmatprep.subr.mxu1 %v1486_v5 }
 0x1f5   : > { %v1024_v14 = vpop.f32.mrf.mxu1 }
 0x1f6   : > { %v506_v15 = vsel %vm498_vm1, %v1024_v14, -inf }
 0x1f7   : > { %v507_v16 = vrot.slane %v506_v15, 4  ;;  %v489_v17 = vpop.f32.mrf.mxu1 }
 0x1f8   : > { %v499_v18 = vsel %vm498_vm1, %v489_v17, -inf }
 0x1f9   : > { %v508_v19 = vmax.f32 %v506_v15, %v507_v16  ;;  %v500_v20 = vrot.slane %v499_v18, 4 }
 0x1fb   : > { %v509_v21 = vrot.slane %v508_v19, 2  ;;  %v501_v22 = vmax.f32 %v499_v18, %v500_v20 }
 0x1fd   : > { %v510_v23 = vmax.f32 %v508_v19, %v509_v21  ;;  %v502_v24 = vrot.slane %v501_v22, 2 }
 0x1ff   : > { %v511_v25 = vrot.slane %v510_v23, 1  ;;  %v503_v26 = vmax.f32 %v501_v22, %v502_v24 }
 0x201   : > { %v512_v27 = vmax.f32 %v510_v23, %v511_v25  ;;  %v504_v28 = vrot.slane %v503_v26, 1 }
 0x203   : > { %v514_v29 = vsub.f32 %v1024_v14, %v512_v27  ;;  %v505_v30 = vmax.f32 %v503_v26, %v504_v28 }
 0x205   : > { %v517_v31 = vmul.f32 1.442695, %v514_v29  ;;  %v513_v32 = vsub.f32 %v489_v17, %v505_v30 }
 0x207   : > { %1127 = vpow2.f32 %v517_v31  ;;  %v515_v33 = vmul.f32 1.442695, %v513_v32 }
 0x209   : > { %1129 = vpow2.f32 %v515_v33 }
 0x214   : > { %v1128_v34 = vpop.eup %1127 }
 0x215   : > { %v526_v35 = vsel %vm498_vm1, %v1128_v34, 0.0 }
 0x216   : > { %v1130_v36 = vpop.eup %1129  ;;  %v527_v37 = vrot.slane %v526_v35, 4 }
 0x217   : > { %v519_v38 = vsel %vm498_vm1, %v1130_v36, 0.0 }
 0x218   : > { %v528_v39 = vadd.f32 %v527_v37, %v526_v35  ;;  %v520_v40 = vrot.slane %v519_v38, 4 }
 0x21a   : > { %v529_v41 = vrot.slane %v528_v39, 2  ;;  %v521_v42 = vadd.f32 %v520_v40, %v519_v38 }
 0x21c   : > { %v530_v43 = vadd.f32 %v529_v41, %v528_v39  ;;  %v522_v44 = vrot.slane %v521_v42, 2 }
 0x21e   : > { %v523_v45 = vadd.f32 %v522_v44, %v521_v42  ;;  %v531_v46 = vrot.slane %v530_v43, 1 }
 0x220   : > { %v524_v47 = vrot.slane %v523_v45, 1  ;;  %v532_v49 = vadd.f32 %v531_v46, %v530_v43 }
 0x222   : > { %v525_v48 = vadd.f32 %v524_v47, %v523_v45 }
 0x224   : > { %1131 = vrcp.f32 %v525_v48 }
 0x225   : > { %1133 = vrcp.f32 %v532_v49 }
 0x231   : > { %v1132_v50 = vpop.eup %1131 }
 0x232   : > { %v535_v51 = vmul.f32 %v1132_v50, %v1130_v36  ;;  %v1134_v52 = vpop.eup %1133 }
 0x233   : > { %v536_v53 = vmul.f32 %v1134_v52, %v1128_v34 }
 0x234   : > { %537 = vxpose.xlu0.b32.start.end [1/1] (short) (narrow) %v535_v51, 16 }
 0x239   : > { %651 = vxpose.xlu0.b32.start.end [1/1] (short) (narrow) %v536_v53, 16 }
 0x2b0   : > { %v553_v54 = vpop.trf.xlu0 }
 0x2b1   : > { %768 = vst.msk [vmem:[%s295_s12] sm:$0xff] %vm569_vm2, %v553_v54  ;;  %1027 = vmatprep.mubr.msk.f32.mxu1 %vm569_vm2, %v553_v54 }
 0x2b4   : > { %v554_v55 = vpop.trf.xlu0 }
 0x2b5   : > { %769 = vst.msk [vmem:[%s295_s12 + $0x8] sm:$0xff] %vm569_vm2, %v554_v55  ;;  %1028 = vmatmul.mubr.msk.f32.vlgmr.msra.gmra.mxu1 %vm569_vm2, %v554_v55 }
 0x2b6   : > { %1031 = vmatpush3.msra.mxu1 %v1486_v5 }
 0x2b8   : > { %v667_v56 = vpop.trf.xlu0 }
 0x2b9   : > { %979 = vst.msk [vmem:[%s295_s12 + $0x10] sm:$0xff] %vm569_vm2, %v667_v56  ;;  %1032 = vmatprep.mubr.msk.f32.mxu1 %vm569_vm2, %v667_v56 }
 0x2bc   : > { %v668_v57 = vpop.trf.xlu0 }
 0x2bd   : > { %980 = vst.msk [vmem:[%s295_s12 + $0x18] sm:$0xff] %vm569_vm2, %v668_v57  ;;  %1033 = vmatmul.mubr.msk.f32.vlgmr.msra.gmra.mxu1 %vm569_vm2, %v668_v57 }
 0x375   : > { %v1029_v58 = vpop.f32.mrf.mxu1 }
 0x376   : > { %765 = vst.msk [vmem:[%s269_s24 + $0x8] sm:$0xff] %vm308_vm0, %v1029_v58 }
 0x377   : > { %v642_v59 = vpop.f32.mrf.mxu1 }
 0x378   : > { %764 = vst.msk [vmem:[%s269_s24] sm:$0xff] %vm308_vm0, %v642_v59 }
 0x37d   : > { %v1034_v60 = vpop.f32.mrf.mxu1 }
 0x37e   : > { %767 = vst.msk [vmem:[%s269_s24 + $0x18] sm:$0xff] %vm308_vm0, %v1034_v60 }
 0x37f   : > { %v755_v61 = vpop.f32.mrf.mxu1 }
 0x380   : > { %766 = vst.msk [vmem:[%s269_s24 + $0x10] sm:$0xff] %vm308_vm0, %v755_v61 }
 0x381   : > { %1228 = shalt.err (!%p1225_p9)
}
 0x382   : > { %s1229_s25 = scalar_lea.hbm %s1517_s10, 512  ;;  %s1233_s12 = scalar_lea.hbm %s1570_s3, 1024 }
 0x383   : > { %p1230_p12 = scmp.ne.s32.totalorder %s1517_s10, %s1229_s25  ;;  %p1234_p7 = scmp.lt.s32.totalorder %s1517_s10, %s1570_s3 }
 0x384   : > { %p1235_p5 = scmp.lt.s32.totalorder %s1233_s12, %s1229_s25 }
 0x385   : > { %p1231_p13 = pnand %p1230_p12, %p1435_p3 }
 0x386   : > { %p1236_p1 = por %p1235_p5, %p1234_p7 }
 0x387   : > { %p1232_p0 = pneg %p1231_p13 }
 0x389   : > { %p1237_p4 = pnand %p1236_p1, %p1232_p0 }
 0x38b   : > { %1240 = shalt.err (!%p1237_p4)
}
 0x38c   : > { %s1307_s22 = smov 128   ;;  %s1308_s6 = smov 8  }
 0x38d   : > { %1045 = dma.vmem_to_hbm [thread:$0]  (%p1435_p3), %s1512_s29, 512, %s1517_s10, %s774_s9, %s1307_s22, %s1307_s22, %s1308_s6  }
 0x38e PF: > { %s820_s5 = sand.u32 1, %s1279_s15   ;;  %p1584_p6 = scmp.ne.s32.totalorder %s1577_s26, 0 }
 0x38f   : > { %p1585_p8 = scmp.ge.s32.totalorder %s1299_s20, 2  ;;  %s821_s11 = scalar_lea.sflag [#allocation5], %s820_s5 }
 0x391   : > { %p1059_p10 = pnand %p1585_p8, %p1584_p6 }
 0x393   : > { %p1060_p11 = pneg %p1059_p10 }
 0x395   : > { %1274 = dma.done.wait (%p1060_p11), %s821_s11, 512  }
 0x396   : > { %1276 = vsyncadd (%p1060_p11), %s821_s11, 4294966784  ;;  %s22_s20 = sadd.s32 1, %s1299_s20   ;;  %s1586_s15 = smov %s1283_s16 }
 0x397   : > { %p19_p2 = scmp.ge.s32.totalorder %s22_s20, 4   ;;  %s1587_s16 = smov %s1287_s17 }
 0x398   : > { %s1588_s17 = smov %s1444_s7  ;;  %s1589_s18 = smov %s1295_s19 }
 0x399   : > { %s1590_s19 = smov %s1592_s21  ;;  %21 = sbr.rel (!%p19_p2) target bundleno = 7 (0x7), region = 103 }
 0x39e   :  { %839 = vsyncpa [#allocation4], 1 }
 0x39f   :  { %841 = vsyncpa [#allocation4 + $0x1], 1 }
 0x3a0   :  { %842 = vsyncpa [#allocation7], 1 }
 0x3a1   :  { %843 = vsyncpa [#allocation5], 1 }
 0x3a2   :  { %845 = vsyncpa [#allocation5 + $0x1], 1 }

</bundles_post_ra>
